<compile_context>
chip_gen: v5e
topology: v5e:2x2
jax: 0.10.0
libtpu: 0.0.40
codegen_flags: <defaults>
</compile_context>

<pallas_src>
import functools

import jax
import jax.numpy as jnp
from jax.experimental import pallas as pl
from jax.experimental.pallas import tpu as pltpu


def _round_up(x, m):
    return ((x + m - 1) // m) * m


def _rms_norm_kernel_w(x_ref, w_ref, o_ref, *, eps, inv_h):
    # All math in f32 (matches `x.float()`).  Single upcast of x; sum -> XLU,
    # rsqrt -> EUP, elementwise muls -> VPU.
    x = x_ref[...].astype(jnp.float32)
    # sum(x*x) * (1/H) == mean(x*x) up to rounding order (block last dim is the true H).
    ms = jnp.sum(x * x, axis=-1, keepdims=True) * inv_h
    y = x * jax.lax.rsqrt(ms + eps)
    o_ref[...] = (y * w_ref[...]).astype(o_ref.dtype)  # weight already f32


def _rms_norm_kernel_nw(x_ref, o_ref, *, eps, inv_h):
    x = x_ref[...].astype(jnp.float32)
    ms = jnp.sum(x * x, axis=-1, keepdims=True) * inv_h
    o_ref[...] = (x * jax.lax.rsqrt(ms + eps)).astype(o_ref.dtype)


def _vmem_capacity_bytes():
    """Per-core VMEM capacity; conservative 64 MiB (v7x) fallback if unavailable."""
    try:
        info = pltpu.get_tpu_info()
        cap = getattr(info, "vmem_capacity_bytes", None)
        if cap:
            return int(cap)
    except Exception:
        pass
    return 64 << 20


def _pick_block_rows(R, H, itemsize, sublane, work_budget):
    """Largest row tile whose double-buffered I/O + f32 temporaries fit `work_budget`.

    Per row: 2 (in+out) x 2 (double buffer) x H x itemsize for the pipelined tiles,
    plus ~4 f32 H-wide temporaries inside the kernel body.
    """
    bytes_per_row = H * (4 * itemsize + 16)
    br = (work_budget // bytes_per_row) // sublane * sublane
    br = max(sublane, br)
    if br >= R:
        # Whole (small) array in one — possibly ragged — tile.
        return _round_up(R, sublane)
    return br


def rms_norm_pallas(x, weight=None, eps=1e-5, *, block_rows=None):
    """RMSNorm over the last axis of `x` using a Pallas TPU kernel.

    x:      any shape (..., H)
    weight: shape (H,) (or anything reshaping to (H,)) or None
    """
    orig_shape = x.shape
    H = orig_shape[-1]
    x2d = x.reshape(-1, H)          # free row-major reshape
    R = x2d.shape[0]

    itemsize = jnp.dtype(x.dtype).itemsize
    sublane = 8 if itemsize >= 4 else (16 if itemsize == 2 else 32)

    # Generation-aware budgets.
    vmem_cap = _vmem_capacity_bytes()
    if vmem_cap >= (100 << 20):            # v5e / v6e: 128 MiB VMEM
        work_budget, vmem_cap_limit = 64 << 20, 112 << 20
    else:                                  # v7x: 64 MiB per TensorCore — leave headroom
        work_budget, vmem_cap_limit = 32 << 20, 48 << 20

    if block_rows is None:
        block_rows = _pick_block_rows(R, H, itemsize, sublane, work_budget)
    else:
        block_rows = _round_up(block_rows, sublane)

    grid = (pl.cdiv(R, block_rows),)
    inv_h = 1.0 / float(H)

    # Ragged last block: Pallas masks out-of-bounds output rows on writeback.
    # OOB *input* rows contain unspecified data — safe only because each row is
    # normalized independently (invariant: no cross-row reduction in the kernel).
    x_spec = pl.BlockSpec((block_rows, H), lambda i: (i, 0))
    o_spec = pl.BlockSpec((block_rows, H), lambda i: (i, 0))

    tile_in_bytes = block_rows * H * itemsize
    tile_f32_bytes = block_rows * H * 4
    vmem_needed = 2 * 2 * tile_in_bytes + 4 * tile_f32_bytes + H * 4
    vmem_limit = int(min(vmem_cap_limit, max(32 << 20, vmem_needed + (8 << 20))))

    cparams = pltpu.CompilerParams(
        dimension_semantics=("parallel",),   # shardable across v7x's 2 TCs; no-op on 1-TC chips
        vmem_limit_bytes=vmem_limit,
    )

    bytes_accessed = 2 * R * H * itemsize + (H * 4 if weight is not None else 0)
    cost = pl.CostEstimate(flops=5 * R * H, transcendentals=R,
                           bytes_accessed=bytes_accessed)

    if weight is not None:
        # Pre-cast weight to f32 once in the wrapper; resident (1, H) block.
        w2d = weight.reshape(1, -1).astype(jnp.float32)
        kernel = functools.partial(_rms_norm_kernel_w, eps=eps, inv_h=inv_h)
        out2d = pl.pallas_call(
            kernel,
            out_shape=jax.ShapeDtypeStruct((R, H), x.dtype),
            grid_spec=pltpu.PrefetchScalarGridSpec(
                num_scalar_prefetch=0,
                grid=grid,
                in_specs=[x_spec, pl.BlockSpec((1, H), lambda i: (0, 0))],
                out_specs=o_spec,
            ),
            compiler_params=cparams,
            cost_estimate=cost,
        )(x2d, w2d)
    else:
        kernel = functools.partial(_rms_norm_kernel_nw, eps=eps, inv_h=inv_h)
        out2d = pl.pallas_call(
            kernel,
            out_shape=jax.ShapeDtypeStruct((R, H), x.dtype),
            grid_spec=pltpu.PrefetchScalarGridSpec(
                num_scalar_prefetch=0,
                grid=grid,
                in_specs=[x_spec],
                out_specs=o_spec,
            ),
            compiler_params=cparams,
            cost_estimate=cost,
        )(x2d)

    return out2d.reshape(orig_shape)


def rms_norm_ref(x, weight, eps=1e-5):
    xf = x.astype(jnp.float32)
    out = xf * jax.lax.rsqrt(jnp.mean(xf * xf, axis=-1, keepdims=True) + eps)
    if weight is not None:
        out = out * weight.astype(jnp.float32)
    return out.astype(x.dtype)


if __name__ == "__main__":
    key = jax.random.PRNGKey(0)
    eps = 1e-5

    # RMSNorm(normalized_shape=hidden): batch=2, seq=8, hidden=32
    batch, seq, hidden = 2, 8, 32
    x = jax.random.normal(key, (batch, seq, hidden), dtype=jnp.float32).astype(jnp.bfloat16)
    # Module __init__ initializes weight to ones (deterministic).
    weight = jnp.ones((hidden,), dtype=jnp.float32)

    y = jax.block_until_ready(rms_norm_pallas(x, weight, eps))
    y_ref = rms_norm_ref(x, weight, eps)
    assert y.shape == x.shape and y.dtype == x.dtype
    assert jnp.allclose(y.astype(jnp.float32), y_ref.astype(jnp.float32), atol=1e-2, rtol=1e-2)

    # weight=None path + row count that is not a multiple of the sublane/tile
    # (exercises the ragged-edge grid handling instead of wrapper padding).
    x2 = jax.random.normal(jax.random.PRNGKey(1), (3, 5, hidden), dtype=jnp.float32)
    y2 = jax.block_until_ready(rms_norm_pallas(x2, None, eps))
    y2_ref = rms_norm_ref(x2, None, eps)
    assert y2.shape == x2.shape and y2.dtype == x2.dtype
    assert jnp.allclose(y2, y2_ref, atol=1e-5, rtol=1e-5)

    print("KERNEL_OK")
</pallas_src>

<mosaic_0001>
module attributes {stable_mosaic.version = 11 : i64} {
  func.func @_rms_norm_kernel_w(%arg0: i32, %arg1: memref<16x32xbf16, #tpu.memory_space<vmem>>, %arg2: memref<1x32xf32, #tpu.memory_space<vmem>>, %arg3: memref<16x32xbf16, #tpu.memory_space<vmem>>) attributes {dimension_semantics = [#tpu.dimension_semantics<parallel>], iteration_bounds = array<i64: 1>, scalar_prefetch = 0 : i64, scratch_operands = 0 : i64, tpu.core_type = #tpu.core_type<tc>, window_params = [{transform_indices = @transform_0, window_bounds = array<i64: 16, 32>}, {pipeline_mode = #tpu.pipeline_mode<synchronous>, transform_indices = @transform_1, window_bounds = array<i64: 1, 32>}, {transform_indices = @transform_2, window_bounds = array<i64: 16, 32>}]} {
    %c0 = arith.constant 0 : index
    %c0_0 = arith.constant 0 : index
    %0 = vector.load %arg1[%c0, %c0_0] : memref<16x32xbf16, #tpu.memory_space<vmem>>, vector<16x32xbf16>
    %1 = arith.extf %0 : vector<16x32xbf16> to vector<16x32xf32>
    %2 = arith.mulf %1, %1 : vector<16x32xf32>
    %cst = arith.constant dense<0.000000e+00> : vector<16xf32>
    %3 = vector.multi_reduction <add>, %2, %cst [1] : vector<16x32xf32> to vector<16xf32>
    %4 = vector.shape_cast %3 : vector<16xf32> to vector<16x1xf32>
    %cst_1 = arith.constant 3.125000e-02 : f32
    %5 = vector.broadcast %cst_1 : f32 to vector<16x1xf32>
    %6 = arith.mulf %4, %5 : vector<16x1xf32>
    %cst_2 = arith.constant 9.99999974E-6 : f32
    %7 = vector.broadcast %cst_2 : f32 to vector<16x1xf32>
    %8 = arith.addf %6, %7 : vector<16x1xf32>
    %9 = math.rsqrt %8 : vector<16x1xf32>
    %10 = vector.broadcast %9 : vector<16x1xf32> to vector<16x32xf32>
    %11 = arith.mulf %1, %10 : vector<16x32xf32>
    %c0_3 = arith.constant 0 : index
    %c0_4 = arith.constant 0 : index
    %12 = vector.load %arg2[%c0_3, %c0_4] : memref<1x32xf32, #tpu.memory_space<vmem>>, vector<1x32xf32>
    %13 = vector.broadcast %12 : vector<1x32xf32> to vector<16x32xf32>
    %14 = arith.mulf %11, %13 : vector<16x32xf32>
    %15 = arith.truncf %14 : vector<16x32xf32> to vector<16x32xbf16>
    %c0_5 = arith.constant 0 : index
    %c0_6 = arith.constant 0 : index
    %16 = vector.load %arg3[%c0_5, %c0_6] : memref<16x32xbf16, #tpu.memory_space<vmem>>, vector<16x32xbf16>
    tpu.vector_store %arg3[%c0_5, %c0_6], %15 {strides = array<i32>} : memref<16x32xbf16, #tpu.memory_space<vmem>>, vector<16x32xbf16>,
    return
  }
  func.func @transform_0(%arg0: i32) -> (i32, i32) {
    %c0_i32 = arith.constant 0 : i32
    %c0_i32_0 = arith.constant 0 : i32
    return %arg0, %c0_i32 : i32, i32
  }
  func.func @transform_1(%arg0: i32) -> (i32, i32) {
    %c0_i32 = arith.constant 0 : i32
    %c0_i32_0 = arith.constant 0 : i32
    %c0_i32_1 = arith.constant 0 : i32
    return %c0_i32, %c0_i32_0 : i32, i32
  }
  func.func @transform_2(%arg0: i32) -> (i32, i32) {
    %c0_i32 = arith.constant 0 : i32
    %c0_i32_0 = arith.constant 0 : i32
    return %arg0, %c0_i32 : i32, i32
  }
}

</mosaic_0001>

<bundles_post_ra>
// kernel: tpu_custom_call.1
= control target key start
LH: loop header
LB: loop body
LE: loop exit
PB: predicated region body
PF: predicated region fallthrough
CT: control target
= control target key end

     0   :  { %7 = vsyncpa [#allocation3], 0  ;;  %s239_s0 = inlined_call_operand.hbm [shape: bf16[16,32], index: 0, kind: input, shape index: {}]   ;;  %s240_s1 = inlined_call_operand.hbm [shape: f32[1,32], index: 1, kind: input, shape index: {}]   ;;  %s241_s2 = inlined_call_operand.hbm [shape: bf16[16,32], index: 2, kind: output, shape index: {}]  }
   0x1   :  { %8 = vsyncpa [#allocation6], 0 }
   0x2   :  { %9 = vsyncpa [#allocation4], 0  ;;  %s14_s11 = sshll.u32 %s239_s0, 4  ;;  %s204_s12 = smov [#allocation2]   ;;  %s15_s11 = int_to_ptr.hbm [resolvable:$true] %s14_s11 }
   0x3   :  { %s16_s13 = sshll.u32 %s204_s12, 4  ;;  %s28_s16 = sshll.u32 %s240_s1, 4  ;;  %s17_s13 = int_to_ptr.vmem [resolvable:$true] %s16_s13  ;;  %s29_s16 = int_to_ptr.hbm [resolvable:$true] %s28_s16 }
   0x4   :  { %s205_s17 = smov 64   ;;  %s206_s18 = smov 4  }
   0x5   :  { %22 = dma.hbm_to_vmem [thread:$0]  %s15_s11, 128, %s17_s13, [#allocation3], %s205_s17, %s205_s17, %s206_s18  }
   0x6   :  { %s207_s19 = smov [#allocation5]  }
   0x7   :  { %s30_s20 = sshll.u32 %s207_s19, 4  ;;  %s31_s20 = int_to_ptr.vmem [resolvable:$true] %s30_s20 }
   0x8   :  { %33 = dma.hbm_to_vmem [thread:$0]  %s29_s16, 16, %s31_s20, [#allocation6]  }
   0x9   :  { %198 = dma.done.wait [#allocation3], 128  }
   0xa   :  { %199 = vsyncadd [#allocation3], 4294967168 }
   0xb   :  { %200 = dma.done.wait [#allocation6], 16  }
   0xc   :  { %201 = vsyncadd [#allocation6], 4294967280  ;;  %v113_v0 = vld [vmem:[#allocation2] sm:$0xff]   ;;  %vm48_vm0 = vcmask 261120   ;;  %v121_v21 = vld [vmem:[#allocation5] ss:$0 sm:$0xff] }
   0xd   :  { %v114_v1 = vunpack.c.l.bf16 %v113_v0  ;;  %v115_v3 = vunpack.c.h.bf16 %v113_v0  ;;  %vm89_vm5 = vcmask 257024   ;;  %s208_s0 = smov [#allocation7]   ;;  %s98_s23 = sshll.u32 %s241_s2, 4  ;;  %s99_s23 = int_to_ptr.hbm [resolvable:$true] %s98_s23 }
   0xe   :  { %s96_s1 = sshll.u32 %s208_s0, 4  ;;  %s97_s1 = int_to_ptr.vmem [resolvable:$true] %s96_s1 }
   0xf   :  { %v46_v2 = vmul.f32 %v114_v1, %v114_v1  ;;  %v47_v5 = vmul.f32 %v115_v3, %v115_v3 }
  0x11   :  { %v49_v4 = vsel %vm48_vm0, %v46_v2, 0.0  ;;  %v52_v6 = vsel %vm48_vm0, %v47_v5, 0.0 }
  0x12   :  { %50 = vadd.xlane.f32.xlu0 %v49_v4 }
  0x1a   :  { %53 = vadd.xlane.f32.xlu0 %v52_v6 }
  0x85   :  { %v51_v7 = vpop.xlane.xlu0 %50 }
  0x86   :  { %v55_v8 = vmul.f32 0.03125, %v51_v7 }
  0x88   :  { %v57_v9 = vadd.f32 1e-05, %v55_v8 }
  0x8a   :  { %122 = vrsqrt.f32 %v57_v9  ;;  %vm65_vm2 = vweird.f32 %v57_v9 }
  0x8d   :  { %v54_v10 = vpop.xlane.xlu0 %53 }
  0x8e   :  { %v56_v11 = vmul.f32 0.03125, %v54_v10 }
  0x90   :  { %v123_v12 = vpop.eup %122  ;;  %v58_v13 = vadd.f32 1e-05, %v56_v11 }
  0x91   :  { %v60_v14 = vmul.f32 %v123_v12, %v57_v9  ;;  %vm66_vm1 = vweird.f32 %v123_v12 }
  0x92   :  { %124 = vrsqrt.f32 %v58_v13  ;;  %vm67_vm3 = vmor %vm65_vm2, %vm66_vm1  ;;  %vm75_vm6 = vweird.f32 %v58_v13 }
  0x93   :  { %v61_v15 = vmul.f32 %v123_v12, %v60_v14 }
  0x95   :  { %v62_v16 = vmul.f32 0.5, %v61_v15 }
  0x97   :  { %v63_v17 = vsub.f32 1.5, %v62_v16 }
  0x98   :  { %v125_v18 = vpop.eup %124 }
  0x99   :  { %v64_v19 = vmul.f32 %v123_v12, %v63_v17  ;;  %v70_v20 = vmul.f32 %v125_v18, %v58_v13  ;;  %vm76_vm4 = vweird.f32 %v125_v18 }
  0x9a   :  { %vm77_vm7 = vmor %vm75_vm6, %vm76_vm4 }
  0x9b   :  { %v68_v22 = vsel %vm67_vm3, %v123_v12, %v64_v19  ;;  %v71_v23 = vmul.f32 %v125_v18, %v70_v20 }
  0x9c   :  { %v79_v24 = vmul.f32 %v114_v1, %v68_v22 }
  0x9d   :  { %v72_v25 = vmul.f32 0.5, %v71_v23 }
  0x9e   :  { %v85_v26 = vmul.f32 %v121_v21, %v79_v24 }
  0x9f   :  { %v73_v27 = vsub.f32 1.5, %v72_v25 }
  0xa0   :  { %v87_v28 = vpack.c.bf16 %v85_v26, %v85_v26 }
  0xa1   :  { %v74_v29 = vmul.f32 %v125_v18, %v73_v27 }
  0xa2   :  { %90 = vst.msk [vmem:[#allocation7] sm:$0xf] %vm89_vm5, %v87_v28 }
  0xa3   :  { %v78_v30 = vsel %vm77_vm7, %v125_v18, %v74_v29 }
  0xa4   :  { %v80_v31 = vmul.f32 %v115_v3, %v78_v30 }
  0xa6   :  { %v86_v32 = vmul.f32 %v121_v21, %v80_v31 }
  0xa8   :  { %v88_v33 = vpack.c.bf16 %v86_v32, %v86_v32 }
  0xaa   :  { %91 = vst.msk [vmem:[#allocation7 + $0x4] sm:$0xf] %vm89_vm5, %v88_v33 }
  0xab   :  { %104 = dma.vmem_to_hbm [thread:$0]  %s97_s1, 128, %s99_s23, [#allocation4], %s205_s17, %s205_s17, %s206_s18  }
  0xac   :  { %202 = dma.done.wait [#allocation4], 128  }
  0xad   :  { %203 = vsyncadd [#allocation4], 4294967168 }
  0xae   :  { %109 = vsyncpa [#allocation3], 1 }
  0xaf   :  { %110 = vsyncpa [#allocation6], 1 }
  0xb0   :  { %111 = vsyncpa [#allocation4], 1 }

</bundles_post_ra>
